<compile_context>
chip_gen: v5e
topology: v5e:2x2
jax: 0.10.0
libtpu: 0.0.40
codegen_flags: <defaults>
</compile_context>

<pallas_src>
import jax
import jax.numpy as jnp
from jax.experimental import pallas as pl
from jax.experimental.pallas import tpu as pltpu

_LANE = 128   # lane width: last-dim granularity for dense (unmasked) stores
_SUB = 16     # sublane granularity that also covers bf16 (16,128) packing


def _round_up(x: int, m: int) -> int:
    return ((x + m - 1) // m) * m


def _mlp3_kernel(act_ref,          # SMEM (4,): [a1, b1, a2, b2] of LearnableSquare
                 x_ref,            # VMEM (tm, K0)    matmul dtype
                 w1_ref, b1_ref,   # VMEM (K0, H1) matmul dtype, (1, H1) f32
                 w2_ref, b2_ref,   # VMEM (H1, H2) matmul dtype, (1, H2) f32
                 w3_ref, b3_ref,   # VMEM (H2, Cp) matmul dtype, (1, Cp) f32
                 o_ref):           # VMEM (tm, Cp) f32
    a1 = act_ref[0]
    c1 = act_ref[1]
    a2 = act_ref[2]
    c2 = act_ref[3]

    mm_dtype = w2_ref.dtype

    # d1 + act1:  a*h*h + b*h  ==  h * (a*h + b)  (one fewer vmul per vreg).
    h1 = jnp.dot(x_ref[...], w1_ref[...],
                 preferred_element_type=jnp.float32) + b1_ref[...]
    h1 = h1 * (a1 * h1 + c1)                       # f32 elementwise (v5e-safe)

    # d2 + act2 (cast to matmul dtype only right before the dot).
    h2 = jnp.dot(h1.astype(mm_dtype), w2_ref[...],
                 preferred_element_type=jnp.float32) + b2_ref[...]
    h2 = h2 * (a2 * h2 + c2)

    # d3 (no activation). Output block is lane-dense (Cp = multiple of 128).
    out = jnp.dot(h2.astype(mm_dtype), w3_ref[...],
                  preferred_element_type=jnp.float32) + b3_ref[...]
    o_ref[...] = out.astype(o_ref.dtype)


def mlp3_forward(x, w1, b1, a1, c1, w2, b2, a2, c2, w3, b3,
                 *, block_m=1024, matmul_dtype=jnp.bfloat16):
    """MLP3 forward pass.

    x : (M, K0) f32
    w1: (K0, H1), b1: (H1,)   -- weights already transposed to (in, out)
    w2: (H1, H2), b2: (H2,)
    w3: (H2, C),  b3: (C,)
    a1, c1, a2, c2: (1,) LearnableSquare params (a*x*x + b*x).
    matmul_dtype: dtype of MXU operands (bf16 default; f32 accumulation always).
    """
    M, K0 = x.shape
    H1 = w1.shape[1]
    H2 = w2.shape[1]
    C = w3.shape[1]

    # --- batch tiling -------------------------------------------------------
    block_m = _round_up(max(int(block_m), _SUB), _SUB)
    m_min = _round_up(M, _SUB)
    # Keep >=2 grid steps when possible so the "parallel" batch axis can be
    # sharded across both v7x TensorCores (no effect on single-TC v5e/v6e).
    two_step_tm = _round_up(pl.cdiv(m_min, 2), _SUB)
    tm = min(block_m, max(_SUB, two_step_tm))
    m_pad = _round_up(M, tm)
    grid = (m_pad // tm,)

    if m_pad != M:
        x = jnp.pad(x, ((0, m_pad - M), (0, 0)))

    # --- lane-dense output: pad nb_classes up to a full 128-lane register ---
    c_pad = _round_up(C, _LANE)
    if c_pad != C:
        w3 = jnp.pad(w3, ((0, 0), (0, c_pad - C)))
        b3 = jnp.pad(b3, ((0, c_pad - C),))

    # --- operand dtype prep (halves streamed x bytes when bf16) -------------
    xq = x.astype(matmul_dtype)
    w1q = w1.astype(matmul_dtype)
    w2q = w2.astype(matmul_dtype)
    w3q = w3.astype(matmul_dtype)
    b1r = b1.reshape(1, H1).astype(jnp.float32)
    b2r = b2.reshape(1, H2).astype(jnp.float32)
    b3r = b3.reshape(1, c_pad).astype(jnp.float32)
    act_params = jnp.concatenate([a1, c1, a2, c2]).astype(jnp.float32)  # SMEM

    mm_bytes = jnp.dtype(matmul_dtype).itemsize
    flops = 2 * m_pad * (K0 * H1 + H1 * H2 + H2 * c_pad) + 6 * m_pad * (H1 + H2)
    bytes_accessed = (mm_bytes * (m_pad * K0 + K0 * H1 + H1 * H2 + H2 * c_pad)
                      + 4 * (m_pad * c_pad + H1 + H2 + c_pad + 4))

    out = pl.pallas_call(
        _mlp3_kernel,
        out_shape=jax.ShapeDtypeStruct((m_pad, c_pad), jnp.float32),
        grid=grid,
        in_specs=[
            pl.BlockSpec(memory_space=pltpu.SMEM),         # LearnableSquare params
            pl.BlockSpec((tm, K0), lambda i: (i, 0)),      # x tile (streamed)
            pl.BlockSpec((K0, H1), lambda i: (0, 0)),      # w1 (resident)
            pl.BlockSpec((1, H1), lambda i: (0, 0)),       # b1
            pl.BlockSpec((H1, H2), lambda i: (0, 0)),      # w2
            pl.BlockSpec((1, H2), lambda i: (0, 0)),       # b2
            pl.BlockSpec((H2, c_pad), lambda i: (0, 0)),   # w3 (lane-dense padded)
            pl.BlockSpec((1, c_pad), lambda i: (0, 0)),    # b3
        ],
        out_specs=pl.BlockSpec((tm, c_pad), lambda i: (i, 0)),
        compiler_params=pltpu.CompilerParams(
            dimension_semantics=("parallel",),   # v7x: shard grid across both TCs
            vmem_limit_bytes=32 << 20,           # guardrail for v7x's 64 MiB VMEM
        ),
        cost_estimate=pl.CostEstimate(
            flops=flops, transcendentals=0, bytes_accessed=bytes_accessed),
    )(act_params, xq, w1q, b1r, w2q, b2r, w3q, b3r)

    return out[:M, :C]


def mlp3_ref(x, w1, b1, a1, c1, w2, b2, a2, c2, w3, b3, matmul_dtype=None):
    """Pure-JAX reference matching the PyTorch module.

    matmul_dtype=None  -> exact f32 reference (the module's semantics).
    matmul_dtype=bf16  -> same mixed-precision matmuls as the kernel.
    """
    def mm(a, b):
        if matmul_dtype is not None:
            a = a.astype(matmul_dtype)
            b = b.astype(matmul_dtype)
        return jnp.dot(a, b, preferred_element_type=jnp.float32)

    h1 = mm(x, w1) + b1
    h1 = a1[0] * h1 * h1 + c1[0] * h1
    h2 = mm(h1, w2) + b2
    h2 = a2[0] * h2 * h2 + c2[0] * h2
    return mm(h2, w3) + b3


if __name__ == "__main__":
    key = jax.random.PRNGKey(0)
    keys = jax.random.split(key, 11)

    # Small shapes consistent with MLP3(input_sz, hidden1, hidden2, nb_classes).
    batch, input_sz, hidden1, hidden2, nb_classes = 64, 32, 64, 32, 8

    def linear_init(kw, kb, fan_in, fan_out):
        # Mirrors PyTorch nn.Linear default init scale (uniform +-1/sqrt(fan_in)).
        bound = float(1.0 / (fan_in ** 0.5))
        w = jax.random.uniform(kw, (fan_in, fan_out), jnp.float32, -bound, bound)
        b = jax.random.uniform(kb, (fan_out,), jnp.float32, -bound, bound)
        return w, b

    w1, b1 = linear_init(keys[0], keys[1], input_sz, hidden1)
    w2, b2 = linear_init(keys[2], keys[3], hidden1, hidden2)
    w3, b3 = linear_init(keys[4], keys[5], hidden2, nb_classes)

    # LearnableSquare params ~ torch.normal(0, 1, size=(1,))
    a1 = jax.random.normal(keys[6], (1,), jnp.float32)
    c1 = jax.random.normal(keys[7], (1,), jnp.float32)
    a2 = jax.random.normal(keys[8], (1,), jnp.float32)
    c2 = jax.random.normal(keys[9], (1,), jnp.float32)

    x = jax.random.normal(keys[10], (batch, input_sz), jnp.float32)
    params = (w1, b1, a1, c1, w2, b2, a2, c2, w3, b3)

    # 1) Default (bf16 matmul operands, f32 accumulation / activations).
    y_bf16 = jax.block_until_ready(mlp3_forward(x, *params))
    # 2) Exact f32 mode (verifies module semantics bit-for-bit-ish).
    y_f32 = jax.block_until_ready(
        mlp3_forward(x, *params, matmul_dtype=jnp.float32))

    ref_f32 = mlp3_ref(x, *params)
    ref_bf16 = mlp3_ref(x, *params, matmul_dtype=jnp.bfloat16)

    assert y_bf16.shape == (batch, nb_classes)
    assert y_f32.shape == (batch, nb_classes)

    # f32-mode kernel must match the exact reference tightly.
    assert jnp.allclose(y_f32, ref_f32, atol=1e-3, rtol=1e-3), float(
        jnp.max(jnp.abs(y_f32 - ref_f32)))
    # bf16-mode kernel must match the same-precision reference tightly ...
    assert jnp.allclose(y_bf16, ref_bf16, atol=5e-3, rtol=5e-3), float(
        jnp.max(jnp.abs(y_bf16 - ref_bf16)))
    # ... and stay within a few percent of the exact f32 module output.
    rel = float(jnp.max(jnp.abs(y_bf16 - ref_f32))
                / (jnp.max(jnp.abs(ref_f32)) + 1e-6))
    assert rel < 0.05, rel

    print("KERNEL_OK")
</pallas_src>

<mosaic_0001>
module attributes {stable_mosaic.version = 11 : i64} {
  func.func @_mlp3_kernel(%arg0: i32, %arg1: memref<4xf32, #tpu.memory_space<smem>>, %arg2: memref<32x32xbf16, #tpu.memory_space<vmem>>, %arg3: memref<32x64xbf16, #tpu.memory_space<vmem>>, %arg4: memref<1x64xf32, #tpu.memory_space<vmem>>, %arg5: memref<64x32xbf16, #tpu.memory_space<vmem>>, %arg6: memref<1x32xf32, #tpu.memory_space<vmem>>, %arg7: memref<32x128xbf16, #tpu.memory_space<vmem>>, %arg8: memref<1x128xf32, #tpu.memory_space<vmem>>, %arg9: memref<32x128xf32, #tpu.memory_space<vmem>>) attributes {dimension_semantics = [#tpu.dimension_semantics<parallel>], iteration_bounds = array<i64: 2>, scalar_prefetch = 0 : i64, scratch_operands = 0 : i64, tpu.core_type = #tpu.core_type<tc>, window_params = [{transform_indices = @transform_0, window_bounds = array<i64: 4>}, {transform_indices = @transform_1, window_bounds = array<i64: 32, 32>}, {pipeline_mode = #tpu.pipeline_mode<synchronous>, transform_indices = @transform_2, window_bounds = array<i64: 32, 64>}, {pipeline_mode = #tpu.pipeline_mode<synchronous>, transform_indices = @transform_3, window_bounds = array<i64: 1, 64>}, {pipeline_mode = #tpu.pipeline_mode<synchronous>, transform_indices = @transform_4, window_bounds = array<i64: 64, 32>}, {pipeline_mode = #tpu.pipeline_mode<synchronous>, transform_indices = @transform_5, window_bounds = array<i64: 1, 32>}, {pipeline_mode = #tpu.pipeline_mode<synchronous>, transform_indices = @transform_6, window_bounds = array<i64: 32, 128>}, {pipeline_mode = #tpu.pipeline_mode<synchronous>, transform_indices = @transform_7, window_bounds = array<i64: 1, 128>}, {transform_indices = @transform_8, window_bounds = array<i64: 32, 128>}]} {
    %c0 = arith.constant 0 : index
    %0 = memref.load %arg1[%c0] : memref<4xf32, #tpu.memory_space<smem>>
    %c1 = arith.constant 1 : index
    %1 = memref.load %arg1[%c1] : memref<4xf32, #tpu.memory_space<smem>>
    %c2 = arith.constant 2 : index
    %2 = memref.load %arg1[%c2] : memref<4xf32, #tpu.memory_space<smem>>
    %c3 = arith.constant 3 : index
    %3 = memref.load %arg1[%c3] : memref<4xf32, #tpu.memory_space<smem>>
    %c0_0 = arith.constant 0 : index
    %c0_1 = arith.constant 0 : index
    %4 = vector.load %arg2[%c0_0, %c0_1] : memref<32x32xbf16, #tpu.memory_space<vmem>>, vector<32x32xbf16>
    %c0_2 = arith.constant 0 : index
    %c0_3 = arith.constant 0 : index
    %5 = vector.load %arg3[%c0_2, %c0_3] : memref<32x64xbf16, #tpu.memory_space<vmem>>, vector<32x64xbf16>
    %cst = arith.constant dense<0.000000e+00> : vector<32x64xf32>
    %6 = tpu.matmul %4, %5, %cst {dimension_numbers = #tpu.dot_dimension_numbers<[1], [0], [0], [1], [0, 0, 1, 1], [], []>} : vector<32x32xbf16>, vector<32x64xbf16>, vector<32x64xf32> -> vector<32x64xf32>
    %c0_4 = arith.constant 0 : index
    %c0_5 = arith.constant 0 : index
    %7 = vector.load %arg4[%c0_4, %c0_5] : memref<1x64xf32, #tpu.memory_space<vmem>>, vector<1x64xf32>
    %8 = vector.broadcast %7 : vector<1x64xf32> to vector<32x64xf32>
    %9 = arith.addf %6, %8 : vector<32x64xf32>
    %10 = vector.broadcast %0 : f32 to vector<32x64xf32>
    %11 = arith.mulf %10, %9 : vector<32x64xf32>
    %12 = vector.broadcast %1 : f32 to vector<32x64xf32>
    %13 = arith.addf %11, %12 : vector<32x64xf32>
    %14 = arith.mulf %9, %13 : vector<32x64xf32>
    %15 = arith.truncf %14 : vector<32x64xf32> to vector<32x64xbf16>
    %c0_6 = arith.constant 0 : index
    %c0_7 = arith.constant 0 : index
    %16 = vector.load %arg5[%c0_6, %c0_7] : memref<64x32xbf16, #tpu.memory_space<vmem>>, vector<64x32xbf16>
    %cst_8 = arith.constant dense<0.000000e+00> : vector<32x32xf32>
    %17 = tpu.matmul %15, %16, %cst_8 {dimension_numbers = #tpu.dot_dimension_numbers<[1], [0], [0], [1], [0, 0, 1, 1], [], []>} : vector<32x64xbf16>, vector<64x32xbf16>, vector<32x32xf32> -> vector<32x32xf32>
    %c0_9 = arith.constant 0 : index
    %c0_10 = arith.constant 0 : index
    %18 = vector.load %arg6[%c0_9, %c0_10] : memref<1x32xf32, #tpu.memory_space<vmem>>, vector<1x32xf32>
    %19 = vector.broadcast %18 : vector<1x32xf32> to vector<32x32xf32>
    %20 = arith.addf %17, %19 : vector<32x32xf32>
    %21 = vector.broadcast %2 : f32 to vector<32x32xf32>
    %22 = arith.mulf %21, %20 : vector<32x32xf32>
    %23 = vector.broadcast %3 : f32 to vector<32x32xf32>
    %24 = arith.addf %22, %23 : vector<32x32xf32>
    %25 = arith.mulf %20, %24 : vector<32x32xf32>
    %26 = arith.truncf %25 : vector<32x32xf32> to vector<32x32xbf16>
    %c0_11 = arith.constant 0 : index
    %c0_12 = arith.constant 0 : index
    %27 = vector.load %arg7[%c0_11, %c0_12] : memref<32x128xbf16, #tpu.memory_space<vmem>>, vector<32x128xbf16>
    %cst_13 = arith.constant dense<0.000000e+00> : vector<32x128xf32>
    %28 = tpu.matmul %26, %27, %cst_13 {dimension_numbers = #tpu.dot_dimension_numbers<[1], [0], [0], [1], [0, 0, 1, 1], [], []>} : vector<32x32xbf16>, vector<32x128xbf16>, vector<32x128xf32> -> vector<32x128xf32>
    %c0_14 = arith.constant 0 : index
    %c0_15 = arith.constant 0 : index
    %29 = vector.load %arg8[%c0_14, %c0_15] : memref<1x128xf32, #tpu.memory_space<vmem>>, vector<1x128xf32>
    %30 = vector.broadcast %29 : vector<1x128xf32> to vector<32x128xf32>
    %31 = arith.addf %28, %30 : vector<32x128xf32>
    %c0_16 = arith.constant 0 : index
    %c0_17 = arith.constant 0 : index
    %32 = vector.load %arg9[%c0_16, %c0_17] : memref<32x128xf32, #tpu.memory_space<vmem>>, vector<32x128xf32>
    tpu.vector_store %arg9[%c0_16, %c0_17], %31 {strides = array<i32>} : memref<32x128xf32, #tpu.memory_space<vmem>>, vector<32x128xf32>,
    return
  }
  func.func @transform_0(%arg0: i32) -> i32 {
    %c0_i32 = arith.constant 0 : i32
    %c0_i32_0 = arith.constant 0 : i32
    return %c0_i32 : i32
  }
  func.func @transform_1(%arg0: i32) -> (i32, i32) {
    %c0_i32 = arith.constant 0 : i32
    %c0_i32_0 = arith.constant 0 : i32
    return %arg0, %c0_i32 : i32, i32
  }
  func.func @transform_2(%arg0: i32) -> (i32, i32) {
    %c0_i32 = arith.constant 0 : i32
    %c0_i32_0 = arith.constant 0 : i32
    %c0_i32_1 = arith.constant 0 : i32
    return %c0_i32, %c0_i32_0 : i32, i32
  }
  func.func @transform_3(%arg0: i32) -> (i32, i32) {
    %c0_i32 = arith.constant 0 : i32
    %c0_i32_0 = arith.constant 0 : i32
    %c0_i32_1 = arith.constant 0 : i32
    return %c0_i32, %c0_i32_0 : i32, i32
  }
  func.func @transform_4(%arg0: i32) -> (i32, i32) {
    %c0_i32 = arith.constant 0 : i32
    %c0_i32_0 = arith.constant 0 : i32
    %c0_i32_1 = arith.constant 0 : i32
    return %c0_i32, %c0_i32_0 : i32, i32
  }
  func.func @transform_5(%arg0: i32) -> (i32, i32) {
    %c0_i32 = arith.constant 0 : i32
    %c0_i32_0 = arith.constant 0 : i32
    %c0_i32_1 = arith.constant 0 : i32
    return %c0_i32, %c0_i32_0 : i32, i32
  }
  func.func @transform_6(%arg0: i32) -> (i32, i32) {
    %c0_i32 = arith.constant 0 : i32
    %c0_i32_0 = arith.constant 0 : i32
    %c0_i32_1 = arith.constant 0 : i32
    return %c0_i32, %c0_i32_0 : i32, i32
  }
  func.func @transform_7(%arg0: i32) -> (i32, i32) {
    %c0_i32 = arith.constant 0 : i32
    %c0_i32_0 = arith.constant 0 : i32
    %c0_i32_1 = arith.constant 0 : i32
    return %c0_i32, %c0_i32_0 : i32, i32
  }
  func.func @transform_8(%arg0: i32) -> (i32, i32) {
    %c0_i32 = arith.constant 0 : i32
    %c0_i32_0 = arith.constant 0 : i32
    return %arg0, %c0_i32 : i32, i32
  }
}

</mosaic_0001>

<bundles_post_ra>
// kernel: tpu_custom_call.1
= control target key start
LH: loop header
LB: loop body
LE: loop exit
PB: predicated region body
PF: predicated region fallthrough
CT: control target
= control target key end

     0   :  { %13 = vsyncpa [#allocation4], 0  ;;  %s1008_s0 = inlined_call_operand.vmem [shape: f32[4], index: 0, kind: input, shape index: {}]   ;;  %s1009_s1 = inlined_call_operand.vmem [shape: bf16[64,32], index: 1, kind: input, shape index: {}]   ;;  %s1010_s2 = inlined_call_operand.vmem [shape: bf16[32,64], index: 2, kind: input, shape index: {}]   ;;  %s1011_s3 = inlined_call_operand.vmem [shape: f32[1,64], index: 3, kind: input, shape index: {}]   ;;  %s1012_s4 = inlined_call_operand.vmem [shape: bf16[64,32], index: 4, kind: input, shape index: {}]   ;;  %s1013_s5 = inlined_call_operand.vmem [shape: f32[1,32], index: 5, kind: input, shape index: {}]   ;;  %s1014_s6 = inlined_call_operand.vmem [shape: bf16[32,128], index: 6, kind: input, shape index: {}]   ;;  %s1015_s7 = inlined_call_operand.vmem [shape: f32[1,128], index: 7, kind: input, shape index: {}]   ;;  %s1016_s8 = inlined_call_operand.hbm [shape: f32[64,128], index: 8, kind: output, shape index: {}]  }
   0x1   :  { %14 = vsyncpa [#allocation3], 0 }
   0x2   :  { %16 = vsyncpa [#allocation3 + $0x1], 0  ;;  %s883_s27 = smov 0   ;;  %s885_s28 = smov 0  }
   0x3   :  { %s887_s29 = smov 0   ;;  %s889_s30 = smov 0  }
   0x4 LB: > { %s904_s9 = sadd.s32 4294967295, %s833_s30   ;;  %s619_s10 = sadd.s32 4294967294, %s833_s30   ;;  %s833_s30 = sphi %s889_s30, %s1022_s30   ;;  %s829_s29 = sphi %s887_s29, %s1021_s29   ;;  %s825_s28 = sphi %s885_s28, %s1020_s28   ;;  %s821_s27 = sphi %s883_s27, %s1019_s27  }
   0x5   : > { %s908_s11 = sadd.s32 1, %s833_s30   ;;  %s202_s12 = sadd.s32 1, %s829_s29 }
   0x6   : > { %s199_s13 = ssub.s32 %s833_s30, %s908_s11  ;;  %p212_p0 = scmp.ne.s32.totalorder %s829_s29, %s825_s28 }
   0x7   : > { %p200_p1 = scmp.eq.s32.totalorder %s199_s13, 0  ;;  %p213_p2 = scmp.eq.s32.totalorder %s904_s9, 1 }
   0x8   : > { %p218_p3 = scmp.ne.s32.totalorder %s825_s28, %s821_s27  ;;  %p219_p4 = scmp.eq.s32.totalorder %s619_s10, 1 }
   0x9   : > { %s919_s14 = scalar_select %p200_p1, %s829_s29, %s202_s12  }
   0xa   : > { %p921_p5 = por %p213_p2, %p212_p0  ;;  %p925_p6 = por %p219_p4, %p218_p3 }
   0xb   : > { %p620_p7 = scmp.ge.s32.totalorder %s833_s30, 1  ;;  %p226_p8 = scmp.lt.s32.totalorder %s833_s30, 3 }
   0xc   : > { %p711_p9 = scmp.eq.s32.totalorder %s904_s9, 0  ;;  %s238_s19 = sshll.u32 %s1008_s0, 4  ;;  %s239_s19 = int_to_ptr.vmem [resolvable:$true] %s238_s19 }
   0xd   : > { %p227_p10 = pnand %p620_p7, %p226_p8  ;;  %s835_s20 = smov [#allocation2]  }
   0xf   : > { %p703_p11 = pneg %p227_p10  ;;  %278 = sbr.rel (%p227_p10) target bundleno = 487 (0x1e7), region = 52 }
  0x11   : > { %p704_p12 = pnand %p711_p9, %p703_p11 }
  0x13   : > { %706 = dma.vmem_to_smem (!%p704_p12), %s239_s19, 16, %s835_s20, [#allocation4]  }
  0x14   : > { %812 = dma.done.wait (%p711_p9), [#allocation4], 16  }
  0x15   : > { %814 = vsyncadd (%p711_p9), [#allocation4], 4294967280 }
  0x16   : > { %285 = sfence }
  0x17   : > { %v685_v0 = vld [vmem:[%s1010_s2 + $0x8] sm:$0xff]  ;;  %s626_s23 = sshll.u32 %s904_s9, 2  ;;  %v684_v1 = vld [vmem:[%s1010_s2] sm:$0xff]  ;;  %vm360_vm0 = vcmask 261120   ;;  %v689_v4 = vld [vmem:[%s1012_s4 + $0x18] sm:$0xff]  ;;  %s322_s25 = sld [smem:[#allocation2]] }
  0x18   : > { %p315_p13 = scmp.lt.s32.totalorder %s626_s23, 7  ;;  %373 = vmatpush.bf16.msra.mxu0 %v685_v0  ;;  %449 = vmatpush.bf16.msra.mxu1 %v689_v4  ;;  %v688_v5 = vld [vmem:[%s1012_s4 + $0x10] sm:$0xff]  ;;  %v687_v6 = vld [vmem:[%s1012_s4 + $0x8] sm:$0xff]  ;;  %v686_v7 = vld [vmem:[%s1012_s4] sm:$0xff]  ;;  %s628_s12 = sld [smem:[#allocation2 + $0x1]]  ;;  %vm438_vm1 = vcmask 523264  }
  0x19   : > { %693 = vmatpush.bf16.msra.mxu3 %v689_v4  ;;  %v749_v8 = vld [vmem:[%s1011_s3] ss:$0 sm:$0xff]  ;;  %v691_v33 = vld [vmem:[%s1014_s6 + $0x8] sm:$0xff]  ;;  %s629_s20 = sld [smem:[#allocation2 + $0x2]]  ;;  %s311_s24 = sand.u32 1, %s825_s28  }
  0x1a   : > { %s1024_s23 = smov (!%p315_p13, %s626_s23), 7  ;;  %512 = vmatpush.bf16.msra.mxu2 %v691_v33  ;;  %v690_v34 = vld [vmem:[%s1014_s6] sm:$0xff]  ;;  %s530_s22 = scalar_lea.sflag [#allocation3], %s311_s24 }
  0x1b   : > { %s627_s26 = sshll.u32 %s1024_s23, 2  ;;  %v750_v35 = vld [vmem:[%s1013_s5] ss:$0 sm:$0xff]  ;;  %s630_s23 = sld [smem:[#allocation2 + $0x3]] }
  0x1c   : > { %374 = vmatpush.bf16.msra.mxu0 %v684_v1  ;;  %s318_s13 = scalar_lea.vmem %s1009_s1, %s627_s26  ;;  %450 = vmatpush.bf16.msra.mxu1 %v688_v5  ;;  %v751_v60 = vld [vmem:[%s1015_s7] ss:$0 sm:$0xff]  ;;  %s787_s10 = scalar_lea.hbm %s1016_s8, 64 }
  0x1d   : > { %v682_v2 = vld [vmem:[%s318_s13] sm:$0xff]  ;;  %v683_v3 = vld [vmem:[%s318_s13 + $0x8] sm:$0xff]  ;;  %694 = vmatpush.bf16.msra.mxu3 %v688_v5  ;;  %v386_v11 = vstv %s322_s25  ;;  %s625_s25 = sshll.u32 %s311_s24, 5  ;;  %s692_s13 = sshll.u32 %s904_s9, 5 }
  0x1e   : > { %v391_v13 = vstv %s628_s12  ;;  %513 = vmatpush.bf16.msra.mxu2 %v690_v34  ;;  %s313_s12 = scalar_lea.vmem [#allocation5], %s625_s25  ;;  %s541_s19 = scalar_lea.hbm %s1016_s8, %s692_s13 }
  0x1f   : > { %647 = vmatmul.msk.bf16.vlgmr.msra.gmra.mxu0 %vm360_vm0, %v682_v2  ;;  %v464_v38 = vstv %s629_s20  ;;  %s542_s20 = sshll.u32 %s313_s12, 4  ;;  %s544_s21 = sshll.u32 %s541_s19, 4  ;;  %s543_s20 = int_to_ptr.vmem [resolvable:$true] %s542_s20  ;;  %s545_s21 = int_to_ptr.hbm [resolvable:$true] %s544_s21 }
  0x20   : > { %451 = vmatpush.bf16.msra.mxu1 %v687_v6 }
  0x21   : > { %695 = vmatpush.bf16.msra.mxu3 %v687_v6  ;;  %v469_v40 = vstv %s630_s23  ;;  %s781_s23 = sshra.s32 %s545_s21, 4  ;;  %s782_s23 = int_to_ptr.hbm [resolvable:$true] %s781_s23 }
  0x22   : > { %s783_s25 = scalar_lea.hbm %s782_s23, 32  ;;  %p788_p3 = scmp.lt.s32.totalorder %s782_s23, %s1016_s8 }
  0x23   : > { %p784_p0 = scmp.ne.s32.totalorder %s782_s23, %s783_s25  ;;  %p789_p4 = scmp.lt.s32.totalorder %s787_s10, %s783_s25 }
  0x24   : > { %452 = vmatpush.bf16.msra.mxu1 %v686_v7 }
  0x25   : > { %696 = vmatpush.bf16.msra.mxu3 %v686_v7  ;;  %p785_p1 = pnand %p784_p0, %p921_p5  ;;  %p790_p7 = por %p789_p4, %p788_p3 }
  0x27   : > { %p786_p2 = pneg %p785_p1 }
  0x29   : > { %p791_p8 = pnand %p790_p7, %p786_p2 }
  0x2f   : > { %648 = vmatmul.msk.bf16.gmra.mxu0 %vm360_vm0, %v683_v3 }
  0x9c   : > { %v376_v9 = vpop.f32.mrf.mxu0 }
  0x9d   : > { %v377_v10 = vadd.f32 %v749_v8, %v376_v9 }
  0x9f   : > { %v387_v12 = vmul.f32 %v386_v11, %v377_v10 }
  0xa1   : > { %v392_v16 = vadd.f32 %v391_v13, %v387_v12 }
  0xa3   : > { %v396_v19 = vmul.f32 %v392_v16, %v377_v10 }
  0xa4   : > { %v378_v14 = vpop.f32.mrf.mxu0 }
  0xa5   : > { %v379_v15 = vadd.f32 %v749_v8, %v378_v14 }
  0xa7   : > { %v388_v17 = vmul.f32 %v386_v11, %v379_v15 }
  0xa9   : > { %v393_v18 = vadd.f32 %v391_v13, %v388_v17 }
  0xab   : > { %v397_v20 = vmul.f32 %v393_v18, %v379_v15 }
  0xac   : > { %v381_v21 = vpop.f32.mrf.mxu0 }
  0xad   : > { %v400_v22 = vpack.c.bf16 %v397_v20, %v396_v19  ;;  %v382_v23 = vadd.f32 %v749_v8, %v381_v21 }
  0xaf   : > { %665 = vmatmul.msk.bf16.vlgmr.msra.gmra.mxu1 %vm438_vm1, %v400_v22  ;;  %v389_v24 = vmul.f32 %v386_v11, %v382_v23 }
  0xb1   : > { %v394_v27 = vadd.f32 %v391_v13, %v389_v24 }
  0xb3   : > { %v398_v30 = vmul.f32 %v394_v27, %v382_v23 }
  0xb4   : > { %v383_v25 = vpop.f32.mrf.mxu0 }
  0xb5   : > { %v384_v26 = vadd.f32 %v749_v8, %v383_v25 }
  0xb7   : > { %v390_v28 = vmul.f32 %v386_v11, %v384_v26 }
  0xb9   : > { %v395_v29 = vadd.f32 %v391_v13, %v390_v28 }
  0xbb   : > { %v399_v31 = vmul.f32 %v395_v29, %v384_v26 }
  0xbd   : > { %v401_v32 = vpack.c.bf16 %v399_v31, %v398_v30 }
  0xbf   : > { %666 = vmatmul.msk.bf16.vlgmr.msra.gmra.mxu3 %vm438_vm1, %v401_v32 }
 0x12c   : > { %v454_v36 = vpop.f32.mrf.mxu1 }
 0x12d   : > { %v455_v37 = vadd.f32 %v750_v35, %v454_v36 }
 0x12f   : > { %v465_v39 = vmul.f32 %v464_v38, %v455_v37 }
 0x131   : > { %v470_v43 = vadd.f32 %v469_v40, %v465_v39 }
 0x133   : > { %v474_v46 = vmul.f32 %v470_v43, %v455_v37 }
 0x134   : > { %v456_v41 = vpop.f32.mrf.mxu1 }
 0x135   : > { %v457_v42 = vadd.f32 %v750_v35, %v456_v41 }
 0x137   : > { %v466_v44 = vmul.f32 %v464_v38, %v457_v42 }
 0x139   : > { %v471_v45 = vadd.f32 %v469_v40, %v466_v44 }
 0x13b   : > { %v475_v47 = vmul.f32 %v471_v45, %v457_v42 }
 0x13d   : > { %v478_v48 = vpack.c.bf16 %v475_v47, %v474_v46 }
 0x13f   : > { %675 = vmatmul.msk.bf16.vlgmr.msra.gmra.mxu2 %vm360_vm0, %v478_v48 }
 0x142   : > { %v459_v49 = vpop.f32.mrf.mxu3 }
 0x143   : > { %v460_v50 = vadd.f32 %v750_v35, %v459_v49 }
 0x145   : > { %v467_v51 = vmul.f32 %v464_v38, %v460_v50 }
 0x147   : > { %v472_v54 = vadd.f32 %v469_v40, %v467_v51 }
 0x149   : > { %v476_v57 = vmul.f32 %v472_v54, %v460_v50 }
 0x14a   : > { %v461_v52 = vpop.f32.mrf.mxu3 }
 0x14b   : > { %v462_v53 = vadd.f32 %v750_v35, %v461_v52 }
 0x14d   : > { %v468_v55 = vmul.f32 %v464_v38, %v462_v53 }
 0x14f   : > { %v473_v56 = vadd.f32 %v469_v40, %v468_v55 }
 0x151   : > { %v477_v58 = vmul.f32 %v473_v56, %v462_v53 }
 0x153   : > { %v479_v59 = vpack.c.bf16 %v477_v58, %v476_v57 }
 0x155   : > { %676 = vmatmul.msk.bf16.gmra.mxu2 %vm360_vm0, %v479_v59 }
 0x1c2   : > { %v515_v61 = vpop.f32.mrf.mxu2 }
 0x1c3   : > { %v516_v62 = vadd.f32 %v751_v60, %v515_v61 }
 0x1c5   : > { %525 = vst [vmem:[%s313_s12] sm:$0xff] %v516_v62 }
 0x1ca   : > { %v517_v63 = vpop.f32.mrf.mxu2 }
 0x1cb   : > { %v518_v0 = vadd.f32 %v751_v60, %v517_v63 }
 0x1cd   : > { %526 = vst [vmem:[%s313_s12 + $0x8] sm:$0xff] %v518_v0 }
 0x1d8   : > { %v520_v1 = vpop.f32.mrf.mxu2 }
 0x1d9   : > { %v521_v2 = vadd.f32 %v751_v60, %v520_v1 }
 0x1db   : > { %527 = vst [vmem:[%s313_s12 + $0x10] sm:$0xff] %v521_v2 }
 0x1e0   : > { %v522_v3 = vpop.f32.mrf.mxu2 }
 0x1e1   : > { %v523_v4 = vadd.f32 %v751_v60, %v522_v3 }
 0x1e3   : > { %528 = vst [vmem:[%s313_s12 + $0x18] sm:$0xff] %v523_v4 }
 0x1e4   : > { %794 = shalt.err (!%p791_p8)
}
 0x1e5   : > { %s836_s24 = smov 128   ;;  %s837_s12 = smov 8  }
 0x1e6   : > { %701 = dma.vmem_to_hbm [thread:$0]  (%p921_p5), %s543_s20, 512, %s545_s21, %s530_s22, %s836_s24, %s836_s24, %s837_s12  }
 0x1e7 PF: > { %p713_p9 = scmp.ge.s32.totalorder %s833_s30, 2  ;;  %s559_s18 = sand.u32 1, %s821_s27  }
 0x1e8   : > { %s560_s19 = scalar_lea.sflag [#allocation3], %s559_s18 }
 0x1e9   : > { %p708_p10 = pnand %p713_p9, %p925_p6 }
 0x1eb   : > { %p709_p11 = pneg %p708_p10 }
 0x1ed   : > { %816 = dma.done.wait (%p709_p11), %s560_s19, 512  }
 0x1ee   : > { %818 = vsyncadd (%p709_p11), %s560_s19, 4294966784  ;;  %p19_p12 = scmp.ge.s32.totalorder %s908_s11, 4   ;;  %s1019_s27 = smov %s825_s28 }
 0x1ef   : > { %s1020_s28 = smov %s829_s29  ;;  %s1021_s29 = smov %s919_s14 }
 0x1f0   : > { %s1022_s30 = smov %s908_s11  ;;  %21 = sbr.rel (!%p19_p12) target bundleno = 4 (0x4), region = 92 }
 0x1f5   :  { %566 = vsyncpa [#allocation3], 1 }
 0x1f6   :  { %568 = vsyncpa [#allocation3 + $0x1], 1 }
 0x1f7   :  { %569 = vsyncpa [#allocation4], 1 }
 0x1f8   :  { %571 = vsyncpa [#allocation4 + $0x1], 1 }

</bundles_post_ra>
